<compile_context>
chip_gen: v7x
topology: tpu7x:2x2x1
jax: 0.10.0
libtpu: 0.0.40
codegen_flags: <defaults>
</compile_context>

<pallas_src>
import jax
import jax.numpy as jnp
from jax.experimental import pallas as pl
from jax.experimental.pallas import tpu as pltpu


def _round_up(n, m):
    return ((n + m - 1) // m) * m


def mlp_kernel(xT_ref, w1_ref, b1_ref, w2_ref, b2_ref, o_ref):
    # xT_ref: (d_pad, TB)    bf16  streamed batch tile (features on sublanes,
    #                              batch on lanes)
    # w1_ref: (h_pad, d_pad) bf16  resident, PyTorch layout (hidden, in)
    # b1_ref: (h_pad, 1)     f32   resident
    # w2_ref: (h_pad, 1)     f32   resident (second-layer weights as a column)
    # b2_ref: (1,)           f32   SMEM scalar
    # o_ref : (1, TB)        f32   lane-dense output row (batch on lanes)

    # Layer 1 on the MXU: h[h, b] = sum_d w1[h, d] * xT[d, b]  (canonical (M,K)@(K,N))
    h = jax.lax.dot_general(
        w1_ref[...], xT_ref[...],
        dimension_numbers=(((1,), (0,)), ((), ())),
        preferred_element_type=jnp.float32,
    )                                                    # (h_pad, TB), f32
    h = jnp.maximum(h + b1_ref[...], 0.0)                # bias + ReLU (VPU)

    # Layer 2 (output width 1): VPU multiply + sublane reduction (XLU),
    # cheaper than a 1-column MXU matmul.
    z = jnp.sum(h * w2_ref[...], axis=0, keepdims=True) + b2_ref[0]   # (1, TB)

    # Numerically stable sigmoid: exp and approx reciprocal both issue on the EUP.
    num = jnp.exp(jnp.minimum(z, 0.0))
    den = 1.0 + jnp.exp(-jnp.abs(z))
    o_ref[...] = num * pl.reciprocal(den, approx=True)


def _choose_tb(B, tb):
    if tb is None:
        # >= 2 tiles as soon as B > 128 (uses both v7x TCs), capped at 1024 to
        # amortize per-grid-step overhead without wasting padding for small B.
        tb = min(1024, _round_up(max(pl.cdiv(B, 2), 1), 128))
    return _round_up(tb, 128)


def neural_net1_forward(x, w1, b1, w2, b2, *, tb=None):
    """NeuralNet1 forward.

    x : (B, input_size) float32
    w1: (hidden_size, input_size), b1: (hidden_size,)   -- PyTorch layouts
    w2: (1, hidden_size),          b2: (1,)
    returns (B, 1) float32
    """
    B, D = x.shape
    H = w1.shape[0]

    d_pad = _round_up(D, 16)          # bf16 sublane packing only (not 128)
    h_pad = _round_up(H, 16)
    tb = _choose_tb(B, tb)
    b_pad = _round_up(B, tb)
    n_tiles = b_pad // tb

    # One fused wrapper pass: transpose + cast to bf16 + zero-pad.  Zero rows/cols
    # of w1/w2 guarantee padded features / hidden units contribute nothing.
    xT_p = jnp.zeros((d_pad, b_pad), jnp.bfloat16).at[:D, :B].set(
        x.T.astype(jnp.bfloat16))
    w1_p = jnp.zeros((h_pad, d_pad), jnp.bfloat16).at[:H, :D].set(
        w1.astype(jnp.bfloat16))
    b1_p = jnp.zeros((h_pad, 1), jnp.float32).at[:H, 0].set(b1)
    w2_p = jnp.zeros((h_pad, 1), jnp.float32).at[:H, 0].set(w2[0])
    b2_p = b2.astype(jnp.float32).reshape((1,))

    out = pl.pallas_call(
        mlp_kernel,
        out_shape=jax.ShapeDtypeStruct((1, b_pad), jnp.float32),
        grid=(n_tiles,),
        in_specs=[
            pl.BlockSpec((d_pad, tb), lambda i: (0, i),
                         memory_space=pltpu.MemorySpace.VMEM),
            pl.BlockSpec((h_pad, d_pad), lambda i: (0, 0),
                         memory_space=pltpu.MemorySpace.VMEM),
            pl.BlockSpec((h_pad, 1), lambda i: (0, 0),
                         memory_space=pltpu.MemorySpace.VMEM),
            pl.BlockSpec((h_pad, 1), lambda i: (0, 0),
                         memory_space=pltpu.MemorySpace.VMEM),
            pl.BlockSpec(memory_space=pltpu.MemorySpace.SMEM),
        ],
        out_specs=pl.BlockSpec((1, tb), lambda i: (0, i)),
        compiler_params=pltpu.CompilerParams(
            dimension_semantics=("parallel",),
        ),
    )(xT_p, w1_p, b1_p, w2_p, b2_p)

    return out[0, :B].reshape(B, 1)


def init_params(key, input_size, hidden_size):
    # torch nn.Linear-style init: U(-1/sqrt(fan_in), 1/sqrt(fan_in)), PyTorch layouts.
    k1, k2, k3, k4 = jax.random.split(key, 4)
    bound1 = 1.0 / (input_size ** 0.5)
    bound2 = 1.0 / (hidden_size ** 0.5)
    w1 = jax.random.uniform(k1, (hidden_size, input_size), jnp.float32, -bound1, bound1)
    b1 = jax.random.uniform(k2, (hidden_size,), jnp.float32, -bound1, bound1)
    w2 = jax.random.uniform(k3, (1, hidden_size), jnp.float32, -bound2, bound2)
    b2 = jax.random.uniform(k4, (1,), jnp.float32, -bound2, bound2)
    return w1, b1, w2, b2


if __name__ == "__main__":
    batch, input_size, hidden_size = 8, 32, 32
    key = jax.random.PRNGKey(0)
    kx, kp = jax.random.split(key)
    x = jax.random.normal(kx, (batch, input_size), jnp.float32)
    w1, b1, w2, b2 = init_params(kp, input_size, hidden_size)

    y_pred = neural_net1_forward(x, w1, b1, w2, b2)
    jax.block_until_ready(y_pred)

    # Pure-JAX f32 reference (same math as the PyTorch forward); bf16 layer-1
    # operands introduce ~1e-3 error, hence the relaxed tolerance.
    h_ref = jnp.maximum(x @ w1.T + b1, 0.0)
    y_ref = jax.nn.sigmoid(h_ref @ w2.T + b2)
    assert y_pred.shape == (batch, 1)
    assert jnp.allclose(y_pred, y_ref, atol=1e-2, rtol=1e-2), \
        float(jnp.max(jnp.abs(y_pred - y_ref)))

    # Multi-tile path (default adaptive tb -> 2 tiles) with B not dividing tb.
    x2 = jax.random.normal(jax.random.PRNGKey(1), (300, input_size), jnp.float32)
    y2 = neural_net1_forward(x2, w1, b1, w2, b2)
    jax.block_until_ready(y2)
    y2_ref = jax.nn.sigmoid(jnp.maximum(x2 @ w1.T + b1, 0.0) @ w2.T + b2)
    assert y2.shape == (300, 1)
    assert jnp.allclose(y2, y2_ref, atol=1e-2, rtol=1e-2), \
        float(jnp.max(jnp.abs(y2 - y2_ref)))

    # Explicit small-tile override (3 grid steps).
    y3 = neural_net1_forward(x2, w1, b1, w2, b2, tb=128)
    jax.block_until_ready(y3)
    assert jnp.allclose(y3, y2_ref, atol=1e-2, rtol=1e-2), \
        float(jnp.max(jnp.abs(y3 - y2_ref)))

    print("KERNEL_OK")
</pallas_src>

<mosaic_0001>
module attributes {stable_mosaic.version = 11 : i64} {
  func.func @mlp_kernel(%arg0: i32, %arg1: memref<32x128xbf16, #tpu.memory_space<vmem>>, %arg2: memref<32x32xbf16, #tpu.memory_space<vmem>>, %arg3: memref<32x1xf32, #tpu.memory_space<vmem>>, %arg4: memref<32x1xf32, #tpu.memory_space<vmem>>, %arg5: memref<1xf32, #tpu.memory_space<smem>>, %arg6: memref<1x128xf32, #tpu.memory_space<vmem>>) attributes {dimension_semantics = [#tpu.dimension_semantics<parallel>], iteration_bounds = array<i64: 1>, scalar_prefetch = 0 : i64, scratch_operands = 0 : i64, tpu.core_type = #tpu.core_type<tc>, window_params = [{transform_indices = @transform_0, window_bounds = array<i64: 32, 128>}, {pipeline_mode = #tpu.pipeline_mode<synchronous>, transform_indices = @transform_1, window_bounds = array<i64: 32, 32>}, {pipeline_mode = #tpu.pipeline_mode<synchronous>, transform_indices = @transform_2, window_bounds = array<i64: 32, 1>}, {pipeline_mode = #tpu.pipeline_mode<synchronous>, transform_indices = @transform_3, window_bounds = array<i64: 32, 1>}, {transform_indices = @transform_4, window_bounds = array<i64: 1>}, {transform_indices = @transform_5, window_bounds = array<i64: 1, 128>}]} {
    %c0 = arith.constant 0 : index
    %c0_0 = arith.constant 0 : index
    %0 = vector.load %arg2[%c0, %c0_0] : memref<32x32xbf16, #tpu.memory_space<vmem>>, vector<32x32xbf16>
    %c0_1 = arith.constant 0 : index
    %c0_2 = arith.constant 0 : index
    %1 = vector.load %arg1[%c0_1, %c0_2] : memref<32x128xbf16, #tpu.memory_space<vmem>>, vector<32x128xbf16>
    %cst = arith.constant dense<0.000000e+00> : vector<32x128xf32>
    %2 = tpu.matmul %0, %1, %cst {dimension_numbers = #tpu.dot_dimension_numbers<[1], [0], [0], [1], [0, 0, 1, 1], [], []>} : vector<32x32xbf16>, vector<32x128xbf16>, vector<32x128xf32> -> vector<32x128xf32>
    %c0_3 = arith.constant 0 : index
    %c0_4 = arith.constant 0 : index
    %3 = vector.load %arg3[%c0_3, %c0_4] : memref<32x1xf32, #tpu.memory_space<vmem>>, vector<32x1xf32>
    %4 = vector.broadcast %3 : vector<32x1xf32> to vector<32x128xf32>
    %5 = arith.addf %2, %4 : vector<32x128xf32>
    %cst_5 = arith.constant 0.000000e+00 : f32
    %6 = vector.broadcast %cst_5 : f32 to vector<32x128xf32>
    %7 = arith.maximumf %5, %6 : vector<32x128xf32>
    %c0_6 = arith.constant 0 : index
    %c0_7 = arith.constant 0 : index
    %8 = vector.load %arg4[%c0_6, %c0_7] : memref<32x1xf32, #tpu.memory_space<vmem>>, vector<32x1xf32>
    %9 = vector.broadcast %8 : vector<32x1xf32> to vector<32x128xf32>
    %10 = arith.mulf %7, %9 : vector<32x128xf32>
    %cst_8 = arith.constant dense<0.000000e+00> : vector<128xf32>
    %11 = vector.multi_reduction <add>, %10, %cst_8 [0] : vector<32x128xf32> to vector<128xf32>
    %12 = vector.shape_cast %11 : vector<128xf32> to vector<1x128xf32>
    %c0_9 = arith.constant 0 : index
    %13 = memref.load %arg5[%c0_9] : memref<1xf32, #tpu.memory_space<smem>>
    %14 = vector.broadcast %13 : f32 to vector<1x128xf32>
    %15 = arith.addf %12, %14 : vector<1x128xf32>
    %cst_10 = arith.constant 0.000000e+00 : f32
    %16 = vector.broadcast %cst_10 : f32 to vector<1x128xf32>
    %17 = arith.minimumf %15, %16 : vector<1x128xf32>
    %18 = math.exp %17 : vector<1x128xf32>
    %19 = math.absf %15 : vector<1x128xf32>
    %cst_11 = arith.constant 0.000000e+00 : f32
    %20 = vector.broadcast %cst_11 : f32 to vector<1x128xf32>
    %21 = arith.subf %20, %19 : vector<1x128xf32>
    %22 = math.exp %21 : vector<1x128xf32>
    %cst_12 = arith.constant 1.000000e+00 : f32
    %23 = vector.broadcast %cst_12 : f32 to vector<1x128xf32>
    %24 = arith.addf %23, %22 : vector<1x128xf32>
    %25 = tpu.reciprocal %24 {approx = true} : vector<1x128xf32> -> vector<1x128xf32>
    %26 = arith.mulf %18, %25 : vector<1x128xf32>
    %c0_13 = arith.constant 0 : index
    %c0_14 = arith.constant 0 : index
    %27 = vector.load %arg6[%c0_13, %c0_14] : memref<1x128xf32, #tpu.memory_space<vmem>>, vector<1x128xf32>
    tpu.vector_store %arg6[%c0_13, %c0_14], %26 {strides = array<i32>} : memref<1x128xf32, #tpu.memory_space<vmem>>, vector<1x128xf32>,
    return
  }
  func.func @transform_0(%arg0: i32) -> (i32, i32) {
    %c0_i32 = arith.constant 0 : i32
    %c0_i32_0 = arith.constant 0 : i32
    return %c0_i32, %arg0 : i32, i32
  }
  func.func @transform_1(%arg0: i32) -> (i32, i32) {
    %c0_i32 = arith.constant 0 : i32
    %c0_i32_0 = arith.constant 0 : i32
    %c0_i32_1 = arith.constant 0 : i32
    return %c0_i32, %c0_i32_0 : i32, i32
  }
  func.func @transform_2(%arg0: i32) -> (i32, i32) {
    %c0_i32 = arith.constant 0 : i32
    %c0_i32_0 = arith.constant 0 : i32
    %c0_i32_1 = arith.constant 0 : i32
    return %c0_i32, %c0_i32_0 : i32, i32
  }
  func.func @transform_3(%arg0: i32) -> (i32, i32) {
    %c0_i32 = arith.constant 0 : i32
    %c0_i32_0 = arith.constant 0 : i32
    %c0_i32_1 = arith.constant 0 : i32
    return %c0_i32, %c0_i32_0 : i32, i32
  }
  func.func @transform_4(%arg0: i32) -> i32 {
    %c0_i32 = arith.constant 0 : i32
    %c0_i32_0 = arith.constant 0 : i32
    return %c0_i32 : i32
  }
  func.func @transform_5(%arg0: i32) -> (i32, i32) {
    %c0_i32 = arith.constant 0 : i32
    %c0_i32_0 = arith.constant 0 : i32
    return %c0_i32, %arg0 : i32, i32
  }
}

</mosaic_0001>

<bundles_post_ra>
// kernel: tpu_custom_call.1
= control target key start
LH: loop header
LB: loop body
LE: loop exit
PB: predicated region body
PF: predicated region fallthrough
CT: control target
= control target key end

     0   :  { %vm77_vm0 = vcmask 261120   ;;  %v258_v3 = vmov 0   ;;  %s343_s0 = inlined_call_operand.vmem [shape: bf16[32,128], index: 0, kind: input, shape index: {}]   ;;  %s344_s1 = inlined_call_operand.vmem [shape: bf16[32,32], index: 1, kind: input, shape index: {}]   ;;  %s345_s2 = inlined_call_operand.vmem [shape: f32[32,1], index: 2, kind: input, shape index: {}]   ;;  %s346_s3 = inlined_call_operand.vmem [shape: f32[32,1], index: 3, kind: input, shape index: {}]   ;;  %s347_s4 = inlined_call_operand.<no memory space> [shape: f32[1], index: 4, kind: input, shape index: {}]   ;;  %s348_s5 = inlined_call_operand.hbm [shape: f32[1,128], index: 5, kind: output, shape index: {}]  }
   0x1   :  { %v224_v0 = vld [vmem:[%s343_s0] sm:$0xff]   ;;  %v225_v1 = vld [vmem:[%s343_s0 + $0x8] sm:$0xff]   ;;  %222 = vset.pattern.permute.xlu0 %v258_v3  ;;  %223 = vset.pattern.permute.xlu1 %v258_v3  ;;  %v33_v5 = vld [vmem:[%s345_s2 + $0x10] sm:$0xff] }
   0x2   :  { %212 = vmatprep.subr.bf16.mxu0 %v224_v0  ;;  %v226_v2 = vld [vmem:[%s344_s1] sm:$0xff]   ;;  %v227_v6 = vld [vmem:[%s344_s1 + $0x8] sm:$0xff]   ;;  %47 = vperm.xlu1 %223, %v33_v5   ;;  %v34_v8 = vld [vmem:[%s345_s2 + $0x18] sm:$0xff] }
   0x3   :  { %213 = vmatpush3.bf16.msra.mxu0 %v224_v0  ;;  %216 = vmatprep.mubr.msk.bf16.mxu0 %vm77_vm0, %v226_v2  ;;  %v31_v4 = vld [vmem:[%s345_s2] sm:$0xff]  ;;  %v32_v7 = vld [vmem:[%s345_s2 + $0x8] sm:$0xff] }
   0x4   :  { %214 = vmatprep.subr.bf16.mxu0 %v225_v1  ;;  %37 = vperm.xlu0 %222, %v31_v4  }
   0x5   :  { %11 = vsyncpa [#allocation4], 0  ;;  %v137_v9 = vld [vmem:[%s346_s3] sm:$0xff]  ;;  %v138_v10 = vld [vmem:[%s346_s3 + $0x8] sm:$0xff]  ;;  %v175_v45 = vstv %s347_s4  ;;  %s259_s15 = smov [#allocation3]  }
   0x6   :  { %52 = vperm.xlu1 %223, %v34_v8   ;;  %v139_v11 = vld [vmem:[%s346_s3 + $0x10] sm:$0xff]  ;;  %v140_v12 = vld [vmem:[%s346_s3 + $0x18] sm:$0xff]  ;;  %s194_s16 = sshll.u32 %s259_s15, 4  ;;  %s195_s16 = int_to_ptr.vmem [resolvable:$true] %s194_s16 }
   0x7   :  { %215 = vmatpush3.bf16.msra.mxu0 %v225_v1  ;;  %s234_s4 = scalar_lea.vmem %s195_s16, 16  ;;  %s238_s17 = scalar_lea.vmem %s195_s16, 32 }
   0x8   :  { %42 = vperm.xlu0 %222, %v32_v7   ;;  %p235_p0 = scmp.ne.s32.totalorder %s195_s16, %s234_s4  ;;  %p239_p1 = scmp.lt.s32.totalorder %s195_s16, %s195_s16 }
   0x9   :  { %p240_p2 = scmp.lt.s32.totalorder %s238_s17, %s234_s4 }
   0xa   :  { %217 = vmatmul.mubr.msk.bf16.vlgmr.msra.gmra.mrb[0].mxu0 %vm77_vm0, %v227_v6  ;;  %148 = vperm.xlu1 %223, %v138_v10  }
   0xb   :  { %p241_p3 = por %p240_p2, %p239_p1 }
   0xc   :  { %143 = vperm.xlu0 %222, %v137_v9  }
   0xd   :  { %p242_p4 = pnand %p241_p3, %p235_p0 }
   0xe   :  { %158 = vperm.xlu1 %223, %v140_v12  }
  0x10   :  { %153 = vperm.xlu0 %222, %v139_v11  }
  0x81   :  { %v48_v14 = vpop.permute.xlu1 %47 }
  0x83   :  { %v38_v13 = vpop.permute.xlu0 %37 }
  0x85   :  { %v53_v16 = vpop.permute.xlu1 %52 }
  0x87   :  { %v43_v15 = vpop.permute.xlu0 %42 }
  0x89   :  { %v149_v27 = vpop.permute.xlu1 %148 }
  0x8b   :  { %v144_v22 = vpop.permute.xlu0 %143 }
  0x8d   :  { %v159_v36 = vpop.permute.xlu1 %158 }
  0x8f   :  { %v154_v33 = vpop.permute.xlu0 %153 }
  0xdd   :  { %v218_v17 = vpop.f32.mrb[0].mxu0 }
  0xde   :  { %v118_v18 = vpop.f32.mrb[1].mxu0  ;;  %v127_v19 = vadd.f32 %v218_v17, %v48_v14 }
  0xdf   :  { %v119_v20 = vadd.f32 %v118_v18, %v38_v13  ;;  %v219_v21 = vpop.f32.mrb[2].mxu0 }
  0xe0   :  { %v121_v23 = vpop.f32.mrb[3].mxu0  ;;  %v130_v25 = vadd.f32 %v219_v21, %v53_v16  ;;  %v135_v28 = vmax.f32 %v127_v19, 0.0 }
  0xe1   :  { %v133_v24 = vmax.f32 %v119_v20, 0.0  ;;  %v122_v26 = vadd.f32 %v121_v23, %v43_v15 }
  0xe2   :  { %v136_v31 = vmax.f32 %v130_v25, 0.0  ;;  %v163_v34 = vmul.f32 %v154_v33, %v135_v28 }
  0xe3   :  { %v134_v29 = vmax.f32 %v122_v26, 0.0  ;;  %v161_v30 = vmul.f32 %v144_v22, %v133_v24 }
  0xe4   :  { %v164_v37 = vmul.f32 %v159_v36, %v136_v31 }
  0xe5   :  { %v162_v32 = vmul.f32 %v149_v27, %v134_v29 }
  0xe7   :  { %v165_v35 = vadd.f32 %v162_v32, %v161_v30 }
  0xe9   :  { %v166_v38 = vadd.f32 %v165_v35, %v163_v34 }
  0xeb   :  { %v167_v39 = vadd.f32 %v166_v38, %v164_v37 }
  0xed   :  { %v168_v40 = vrot.slane %v167_v39, 4 }
  0xef   :  { %v169_v41 = vadd.f32 %v168_v40, %v167_v39 }
  0xf1   :  { %v170_v42 = vrot.slane %v169_v41, 2 }
  0xf3   :  { %v171_v43 = vadd.f32 %v170_v42, %v169_v41 }
  0xf5   :  { %v172_v44 = vrot.slane %v171_v43, 1 }
  0xf7   :  { %v173_v46 = vadd.f32 %v172_v44, %v171_v43 }
  0xf9   :  { %v176_v47 = vadd.f32 %v175_v45, %v173_v46 }
  0xfb   :  { %v180_v48 = vand.u32 2147483647, %v176_v47  ;;  %v177_v51 = vmin.f32 %v176_v47, 0.0 }
  0xfd   :  { %v181_v49 = vsub.f32 0.0, %v180_v48  ;;  %v178_v52 = vmul.f32 1.442695, %v177_v51 }
  0xff   :  { %v182_v50 = vmul.f32 1.442695, %v181_v49 }
 0x101   :  { %228 = vpow2.f32 %v182_v50 }
 0x102   :  { %230 = vpow2.f32 %v178_v52 }
 0x10b   :  { %v229_v53 = vpop.eup %228 }
 0x10c   :  { %v184_v54 = vadd.f32 1.0, %v229_v53  ;;  %v231_v55 = vpop.eup %230 }
 0x10e   :  { %232 = vrcp.f32 %v184_v54 }
 0x118   :  { %v233_v56 = vpop.eup %232 }
 0x119   :  { %v186_v57 = vmul.f32 %v233_v56, %v231_v55 }
 0x11b   :  { %187 = vst [vmem:[#allocation3] sm:$0x1] %v186_v57 }
 0x11c   :  { %245 = shalt.err (!%p242_p4)
}
 0x11d   :  { %s246_s20 = scalar_lea.hbm %s348_s5, 16 }
 0x11e   :  { %p247_p5 = scmp.ne.s32.totalorder %s348_s5, %s246_s20  ;;  %p250_p6 = scmp.lt.u32.totalorder %s246_s20, %s348_s5 }
 0x120   :  { %p252_p7 = pnand %p250_p6, %p247_p5 }
 0x122   :  { %255 = shalt.err (!%p252_p7)
}
 0x123   :  { %197 = dma.vmem_to_hbm [thread:$0]  %s195_s16, 16, %s348_s5, [#allocation4]  }
 0x124   :  { %256 = dma.done.wait [#allocation4], 16  }
 0x125   :  { %257 = vsyncadd [#allocation4], 4294967280 }
 0x126   :  { %201 = vsyncpa [#allocation4], 1 }

</bundles_post_ra>
